<compile_context>
chip_gen: v6e
topology: v6e:2x2x1
jax: 0.10.0
libtpu: 0.0.40
codegen_flags: <defaults>
</compile_context>

<pallas_src>
import jax
import jax.numpy as jnp
from jax.experimental import pallas as pl
from jax.experimental.pallas import tpu as pltpu

_LANE = 128
_SUB = 8
_CHUNK_ROWS = 512           # inner accumulation chunk: bounds f32 temporaries to ~256 KiB
_VMEM_LIMIT_BYTES = 48 << 20


def _mse_partial_kernel(x_ref, t_ref, part_ref):
    """One grid step: sum of squared differences over a (tile_rows, 128) tile,
    accumulated chunk-by-chunk into a single (8, 128) f32 partial (VALU adds)."""
    rows = x_ref.shape[0]                       # static; multiple of 8
    n_full = rows // _CHUNK_ROWS
    rem = rows - n_full * _CHUNK_ROWS           # multiple of 8 (possibly 0)

    def chunk_sum(r0, nr):                      # nr is a static multiple of 8
        xd = x_ref[pl.ds(r0, nr), :].astype(jnp.float32)
        td = t_ref[pl.ds(r0, nr), :].astype(jnp.float32)
        d = xd - td
        sq = d * d
        # (nr,128) -> (nr//8, 8, 128): groups whole sublane tiles, no boundary
        # crossing; the axis-0 sum is pure elementwise VALU work.
        return jnp.sum(sq.reshape(nr // _SUB, _SUB, _LANE), axis=0)

    acc = jnp.zeros((_SUB, _LANE), jnp.float32)
    if n_full > 0:
        def body(i, a):
            r0 = pl.multiple_of(i * _CHUNK_ROWS, _CHUNK_ROWS)
            return a + chunk_sum(r0, _CHUNK_ROWS)
        acc = jax.lax.fori_loop(0, n_full, body, acc,
                                unroll=True if n_full <= 8 else 2)
    if rem > 0:
        acc = acc + chunk_sum(n_full * _CHUNK_ROWS, rem)

    part_ref[...] = acc.reshape(1, _SUB, _LANE)


def _default_max_tile_rows():
    """Generation-aware tile rows: v7x (64 MiB VMEM/TC, ~3.2 TB/s HBM) wants
    bigger steps to amortize the ~0.35us/step overhead; v5e/v6e use 8192."""
    try:
        vmem_bytes = pltpu.get_tpu_info().vmem_capacity_bytes
    except Exception:
        vmem_bytes = 128 << 20
    if vmem_bytes <= (64 << 20):
        return 16384      # 8 MiB/input block; 2 inputs x 2 buffers = 32 MiB
    return 8192           # 4 MiB/input block; 16 MiB double-buffered


def _choose_tiling(rows, max_tile_rows):
    """rows >= 8.  Returns (num_tiles, tile_rows) with tile_rows a multiple of 8,
    num_tiles * tile_rows <= rows, and an uncovered tail of < 8*num_tiles rows.
    Guarantees >= 2 tiles when rows >= 16 (lets v7x use both TensorCores)."""
    num = -(-rows // max_tile_rows)             # ceil
    if rows >= 16:
        num = max(num, 2)
    tile_rows = (rows // (_SUB * num)) * _SUB   # multiple of 8, >= 8
    return num, tile_rows


def content_loss_forward(x, target, *, max_tile_rows=None):
    """Returns (loss_scalar, input_passthrough) matching ContentLoss.forward."""
    assert x.shape == target.shape, "input/target shape mismatch"
    n = x.size
    if max_tile_rows is None:
        max_tile_rows = _default_max_tile_rows()

    xf = jnp.ravel(x)
    tf = jnp.ravel(target)

    rows_all = n // _LANE
    lane_tail = n - rows_all * _LANE
    extra = jnp.float32(0.0)                    # tail contributions, summed in JAX

    if rows_all < _SUB:
        # Tiny input (< 1024 elements): a kernel launch isn't worth it.
        d = xf.astype(jnp.float32) - tf.astype(jnp.float32)
        return jnp.sum(d * d) / jnp.float32(n), x

    if lane_tail:
        # Rare: n not a multiple of 128.  Sum the trailing <128 elements in JAX
        # and slice out the lane-aligned prefix (one copy of the prefix only).
        dt = (xf[rows_all * _LANE:].astype(jnp.float32)
              - tf[rows_all * _LANE:].astype(jnp.float32))
        extra = extra + jnp.sum(dt * dt)
        x2 = xf[: rows_all * _LANE].reshape(rows_all, _LANE)
        t2 = tf[: rows_all * _LANE].reshape(rows_all, _LANE)
    else:
        # Common case: free (bitcast) reshape, zero extra HBM traffic.
        x2 = xf.reshape(rows_all, _LANE)
        t2 = tf.reshape(rows_all, _LANE)

    num_tiles, tile_rows = _choose_tiling(rows_all, max_tile_rows)
    covered = num_tiles * tile_rows
    if covered < rows_all:
        # Row tail (< 8*num_tiles rows): folded into the sum in plain JAX,
        # so the kernel grid never reads out of bounds and nothing is padded.
        dr = (x2[covered:].astype(jnp.float32)
              - t2[covered:].astype(jnp.float32))
        extra = extra + jnp.sum(dr * dr)

    partials = pl.pallas_call(
        _mse_partial_kernel,
        out_shape=jax.ShapeDtypeStruct((num_tiles, _SUB, _LANE), jnp.float32),
        grid_spec=pltpu.PrefetchScalarGridSpec(
            num_scalar_prefetch=0,
            grid=(num_tiles,),
            in_specs=[
                pl.BlockSpec((tile_rows, _LANE), lambda i: (i, 0)),
                pl.BlockSpec((tile_rows, _LANE), lambda i: (i, 0)),
            ],
            out_specs=pl.BlockSpec((1, _SUB, _LANE), lambda i: (i, 0, 0)),
        ),
        compiler_params=pltpu.CompilerParams(
            # No carried state across the grid -> parallel (2 TCs on v7x).
            dimension_semantics=("parallel",),
            vmem_limit_bytes=_VMEM_LIMIT_BYTES,
        ),
    )(x2, t2)

    # Second (tiny) reduction stage in JAX; divide by the true element count.
    loss = (jnp.sum(partials) + extra) / jnp.float32(n)

    # Module returns the input unchanged: no HBM round-trip needed.
    return loss, x


if __name__ == "__main__":
    key = jax.random.PRNGKey(0)
    kx, kt = jax.random.split(key)
    # NCHW: batch=2, channels=4, spatial=16x16  (2048 elements -> 16 rows, 2 tiles)
    x = jax.random.normal(kx, (2, 4, 16, 16), dtype=jnp.float32)
    target = jax.random.normal(kt, (2, 4, 16, 16), dtype=jnp.float32)

    fwd = jax.jit(content_loss_forward)
    loss, out = fwd(x, target)
    loss = jax.block_until_ready(loss)
    out = jax.block_until_ready(out)

    # reference check
    ref_loss = jnp.mean((x - target) ** 2)
    assert jnp.allclose(loss, ref_loss, rtol=1e-5, atol=1e-6), (loss, ref_loss)
    assert jnp.array_equal(out, x)

    print("KERNEL_OK")
</pallas_src>

<mosaic_0001>
module attributes {stable_mosaic.version = 11 : i64} {
  func.func @_mse_partial_kernel(%arg0: i32, %arg1: memref<8x128xf32, #tpu.memory_space<vmem>>, %arg2: memref<8x128xf32, #tpu.memory_space<vmem>>, %arg3: memref<1x8x128xf32, #tpu.memory_space<vmem>>) attributes {dimension_semantics = [#tpu.dimension_semantics<parallel>], iteration_bounds = array<i64: 2>, scalar_prefetch = 0 : i64, scratch_operands = 0 : i64, tpu.core_type = #tpu.core_type<tc>, window_params = [{transform_indices = @transform_0, window_bounds = array<i64: 8, 128>}, {transform_indices = @transform_1, window_bounds = array<i64: 8, 128>}, {transform_indices = @transform_2, window_bounds = array<i64: 1, 8, 128>}]} {
    %cst = arith.constant 0.000000e+00 : f32
    %0 = vector.broadcast %cst : f32 to vector<8x128xf32>
    %c0 = arith.constant 0 : index
    %c0_0 = arith.constant 0 : index
    %1 = vector.load %arg1[%c0, %c0_0] : memref<8x128xf32, #tpu.memory_space<vmem>>, vector<8x128xf32>
    %c0_1 = arith.constant 0 : index
    %c0_2 = arith.constant 0 : index
    %2 = vector.load %arg2[%c0_1, %c0_2] : memref<8x128xf32, #tpu.memory_space<vmem>>, vector<8x128xf32>
    %3 = arith.subf %1, %2 : vector<8x128xf32>
    %4 = arith.mulf %3, %3 : vector<8x128xf32>
    %5 = vector.shape_cast %4 : vector<8x128xf32> to vector<1x8x128xf32>
    %cst_3 = arith.constant dense<0.000000e+00> : vector<8x128xf32>
    %6 = vector.multi_reduction <add>, %5, %cst_3 [0] : vector<1x8x128xf32> to vector<8x128xf32>
    %7 = arith.addf %0, %6 : vector<8x128xf32>
    %8 = vector.shape_cast %7 : vector<8x128xf32> to vector<1x8x128xf32>
    %c0_4 = arith.constant 0 : index
    %c0_5 = arith.constant 0 : index
    %c0_6 = arith.constant 0 : index
    %9 = vector.load %arg3[%c0_4, %c0_5, %c0_6] : memref<1x8x128xf32, #tpu.memory_space<vmem>>, vector<1x8x128xf32>
    tpu.vector_store %arg3[%c0_4, %c0_5, %c0_6], %8 {strides = array<i32>} : memref<1x8x128xf32, #tpu.memory_space<vmem>>, vector<1x8x128xf32>,
    return
  }
  func.func @transform_0(%arg0: i32) -> (i32, i32) {
    %c0_i32 = arith.constant 0 : i32
    %c0_i32_0 = arith.constant 0 : i32
    return %arg0, %c0_i32 : i32, i32
  }
  func.func @transform_1(%arg0: i32) -> (i32, i32) {
    %c0_i32 = arith.constant 0 : i32
    %c0_i32_0 = arith.constant 0 : i32
    return %arg0, %c0_i32 : i32, i32
  }
  func.func @transform_2(%arg0: i32) -> (i32, i32, i32) {
    %c0_i32 = arith.constant 0 : i32
    %c0_i32_0 = arith.constant 0 : i32
    %c0_i32_1 = arith.constant 0 : i32
    return %arg0, %c0_i32, %c0_i32_0 : i32, i32, i32
  }
}

</mosaic_0001>

<bundles_post_ra>
// kernel: content_loss_forward.1
= control target key start
LH: loop header
LB: loop body
LE: loop exit
PB: predicated region body
PF: predicated region fallthrough
CT: control target
= control target key end

     0   :  { %s250_s9 = smov 0   ;;  %s278_s0 = inlined_call_operand.vmem [shape: f32[16,128], index: 0, kind: input, shape index: {}]   ;;  %s279_s1 = inlined_call_operand.vmem [shape: f32[16,128], index: 1, kind: input, shape index: {}]   ;;  %s280_s2 = inlined_call_operand.vmem [shape: f32[2,8,128], index: 2, kind: output, shape index: {}]  }
   0x1 LB: > { %s228_s10 = sadd.s32 4294967295, %s252_s9   ;;  %p232_p0 = scmp.ge.s32.totalorder %s252_s9, 1  ;;  %s252_s9 = sphi %s250_s9, %s12_s9  }
   0x2   : > { %p120_p1 = scmp.lt.s32.totalorder %s252_s9, 3 }
   0x4   : > { %p121_p2 = pnand %p232_p0, %p120_p1 }
   0x5   : > { %p144_p3 = scmp.lt.s32.totalorder (!%p121_p2), %s228_s10, 1 }
   0x6   : > { %124 = sbr.rel (%p121_p2) target bundleno = 21 (0x15), region = 28 }
   0xb   : > { %s282_s10 = smov (!%p144_p3, %s228_s10), 1 }
   0xc   : > { %s233_s11 = sshll.u32 %s282_s10, 3 }
   0xd   : > { %s147_s14 = scalar_lea.vmem %s278_s0, %s233_s11  ;;  %s151_s17 = scalar_lea.vmem %s279_s1, %s233_s11 }
   0xe   : > { %v156_v0 = vld [vmem:[%s147_s14] sm:$0xff]  ;;  %s155_s20 = scalar_lea.vmem %s280_s2, %s233_s11 }
   0xf   : > { %v157_v1 = vld [vmem:[%s151_s17] sm:$0xff] }
  0x10   : > { %v158_v2 = vsub.f32 %v156_v0, %v157_v1 }
  0x12   : > { %v159_v3 = vmul.f32 %v158_v2, %v158_v2 }
  0x14   : > { %162 = vst [vmem:[%s155_s20] sm:$0xff] %v159_v3 }
  0x15 PF: > { %s12_s9 = sadd.s32 1, %s252_s9  }
  0x16   : > { %p9_p4 = scmp.ge.s32.totalorder %s12_s9, 4  }
  0x18   :  { %11 = sbr.rel (!%p9_p4) target bundleno = 1 (0x1), region = 61 }

</bundles_post_ra>
